<compile_context>
chip_gen: v5e
topology: v5e:2x2
jax: 0.10.0
libtpu: 0.0.40
codegen_flags: <defaults>
</compile_context>

<pallas_src>
import math

import jax
import jax.numpy as jnp
from jax.experimental import pallas as pl
from jax.experimental.pallas import tpu as pltpu

_LANE = 128
_MAX_LANE_BLOCK = 32768            # max lanes per block
_TARGET_BLOCK_BYTES = 2 * 1024 * 1024  # ~2 MiB per (input) block


def bias_kernel(x_ref, b_ref, o_ref):
    # x_ref: (br, bc) tile of the flattened input
    # b_ref: (1, bc) tile of the flattened bias (broadcast over rows)
    o_ref[...] = x_ref[...] + b_ref[...]


def _sublane(dtype):
    """Sublane alignment for packed dtypes: 8 (32-bit), 16 (16-bit), 32 (8-bit)."""
    bits = jnp.dtype(dtype).itemsize * 8
    return max(8, 256 // bits)


def _pick_col_block(F):
    """Largest lane-aligned block <= _MAX_LANE_BLOCK that divides F, else F."""
    if F % _LANE != 0:
        return F  # full-extent block is always legal
    bc = min(F, _MAX_LANE_BLOCK)
    bc -= bc % _LANE
    while F % bc != 0:
        bc -= _LANE
    return bc


def _pick_row_block(N, bc, dtype):
    """Sublane-aligned row block that divides N and hits the byte target."""
    sub = _sublane(dtype)
    if N % sub != 0:
        return N  # full-extent block is always legal
    target_rows = _TARGET_BLOCK_BYTES // (bc * jnp.dtype(dtype).itemsize)
    br = min(N, max(sub, target_rows))
    br -= br % sub
    br = max(br, sub)
    while N % br != 0:
        br -= sub
    return br


def bias_add(x, b):
    """x: (N, *b.shape), b: parameter -> x + b (same semantics as torch)."""
    N = x.shape[0]
    assert x.shape[1:] == b.shape, (x.shape, b.shape)

    F = math.prod(b.shape) if b.shape else 1

    # Lane-dense flattened views (free reshapes: memory is already contiguous).
    x2 = x.reshape(N, F)
    b2 = b.reshape(1, F)

    bc = _pick_col_block(F)
    br = _pick_row_block(N, bc, x.dtype)

    # Column-block axis OUTER, row-block axis INNER: the bias block index only
    # depends on the outer axis, so it stays resident in VMEM across the whole
    # inner row sweep (fetched exactly once per column block).
    grid = (F // bc, N // br)

    out2 = pl.pallas_call(
        bias_kernel,
        out_shape=jax.ShapeDtypeStruct((N, F), x.dtype),
        grid=grid,
        in_specs=[
            # x: one (br, bc) tile per grid step
            pl.BlockSpec((br, bc), lambda j, i: (i, j)),
            # bias: depends only on the (outer) column block -> no re-fetch on
            # the inner row loop.
            pl.BlockSpec((1, bc), lambda j, i: (0, j)),
        ],
        out_specs=pl.BlockSpec((br, bc), lambda j, i: (i, j)),
        compiler_params=pltpu.CompilerParams(
            dimension_semantics=("parallel", "parallel"),
        ),
    )(x2, b2)

    return out2.reshape(x.shape)


if __name__ == "__main__":
    key = jax.random.PRNGKey(0)
    kx, kb = jax.random.split(key)

    N, C, H, W = 2, 4, 16, 16
    x = jax.random.normal(kx, (N, C, H, W), dtype=jnp.float32)
    # deterministic "parameter" initialization (synthetic, not a checkpoint)
    bias = jax.random.normal(kb, (C, H, W), dtype=jnp.float32)

    out = bias_add(x, bias)
    out = jax.block_until_ready(out)

    # sanity check against plain JAX broadcasting (same semantics as torch)
    ref = x + bias
    assert out.shape == x.shape and out.dtype == x.dtype
    assert jnp.allclose(out, ref, atol=1e-6), "mismatch vs reference"

    print("KERNEL_OK")
</pallas_src>

<mosaic_0001>
module attributes {stable_mosaic.version = 11 : i64} {
  func.func @bias_kernel(%arg0: i32, %arg1: i32, %arg2: memref<2x1024xf32, #tpu.memory_space<vmem>>, %arg3: memref<1x1024xf32, #tpu.memory_space<vmem>>, %arg4: memref<2x1024xf32, #tpu.memory_space<vmem>>) attributes {dimension_semantics = [#tpu.dimension_semantics<parallel>, #tpu.dimension_semantics<parallel>], iteration_bounds = array<i64: 1, 1>, scalar_prefetch = 0 : i64, scratch_operands = 0 : i64, tpu.core_type = #tpu.core_type<tc>, window_params = [{transform_indices = @transform_0, window_bounds = array<i64: 2, 1024>}, {transform_indices = @transform_1, window_bounds = array<i64: 1, 1024>}, {transform_indices = @transform_2, window_bounds = array<i64: 2, 1024>}]} {
    %c0 = arith.constant 0 : index
    %c0_0 = arith.constant 0 : index
    %0 = vector.load %arg2[%c0, %c0_0] : memref<2x1024xf32, #tpu.memory_space<vmem>>, vector<2x1024xf32>
    %c0_1 = arith.constant 0 : index
    %c0_2 = arith.constant 0 : index
    %1 = vector.load %arg3[%c0_1, %c0_2] : memref<1x1024xf32, #tpu.memory_space<vmem>>, vector<1x1024xf32>
    %2 = vector.broadcast %1 : vector<1x1024xf32> to vector<2x1024xf32>
    %3 = arith.addf %0, %2 : vector<2x1024xf32>
    %c0_3 = arith.constant 0 : index
    %c0_4 = arith.constant 0 : index
    %4 = vector.load %arg4[%c0_3, %c0_4] : memref<2x1024xf32, #tpu.memory_space<vmem>>, vector<2x1024xf32>
    tpu.vector_store %arg4[%c0_3, %c0_4], %3 {strides = array<i32>} : memref<2x1024xf32, #tpu.memory_space<vmem>>, vector<2x1024xf32>,
    return
  }
  func.func @transform_0(%arg0: i32, %arg1: i32) -> (i32, i32) {
    %c0_i32 = arith.constant 0 : i32
    return %arg1, %arg0 : i32, i32
  }
  func.func @transform_1(%arg0: i32, %arg1: i32) -> (i32, i32) {
    %c0_i32 = arith.constant 0 : i32
    %c0_i32_0 = arith.constant 0 : i32
    return %c0_i32, %arg0 : i32, i32
  }
  func.func @transform_2(%arg0: i32, %arg1: i32) -> (i32, i32) {
    %c0_i32 = arith.constant 0 : i32
    return %arg1, %arg0 : i32, i32
  }
}

</mosaic_0001>

<bundles_post_ra>
// kernel: tpu_custom_call.1
= control target key start
LH: loop header
LB: loop body
LE: loop exit
PB: predicated region body
PF: predicated region fallthrough
CT: control target
= control target key end

     0   :  { %7 = vsyncpa [#allocation3], 0  ;;  %s203_s0 = inlined_call_operand.hbm [shape: f32[2,1024], index: 0, kind: input, shape index: {}]   ;;  %s204_s1 = inlined_call_operand.hbm [shape: f32[1,1024], index: 1, kind: input, shape index: {}]   ;;  %s205_s2 = inlined_call_operand.hbm [shape: f32[2,1024], index: 2, kind: output, shape index: {}]  }
   0x1   :  { %8 = vsyncpa [#allocation6], 0 }
   0x2   :  { %9 = vsyncpa [#allocation4], 0  ;;  %s15_s11 = sshll.u32 %s203_s0, 4  ;;  %s172_s12 = smov [#allocation2]   ;;  %s16_s11 = int_to_ptr.hbm [resolvable:$true] %s15_s11 }
   0x3   :  { %s17_s13 = sshll.u32 %s172_s12, 4  ;;  %s26_s16 = sshll.u32 %s204_s1, 4  ;;  %s18_s13 = int_to_ptr.vmem [resolvable:$true] %s17_s13  ;;  %s27_s16 = int_to_ptr.hbm [resolvable:$true] %s26_s16 }
   0x4   :  { %20 = dma.hbm_to_vmem [thread:$0]  %s16_s11, 256, %s18_s13, [#allocation3]  }
   0x5   :  { %s173_s17 = smov [#allocation5]  }
   0x6   :  { %s28_s18 = sshll.u32 %s173_s17, 4  ;;  %s29_s18 = int_to_ptr.vmem [resolvable:$true] %s28_s18 }
   0x7   :  { %31 = dma.hbm_to_vmem [thread:$0]  %s27_s16, 128, %s29_s18, [#allocation6]  }
   0x8   :  { %166 = dma.done.wait [#allocation3], 256  }
   0x9   :  { %167 = vsyncadd [#allocation3], 4294967040 }
   0xa   :  { %168 = dma.done.wait [#allocation6], 128  }
   0xb   :  { %169 = vsyncadd [#allocation6], 4294967168  ;;  %v42_v0 = vld [vmem:[#allocation5] sm:$0xff]  ;;  %vm58_vm0 = vcmask 1041408   ;;  %vm60_vm1 = vcmask 1045508   ;;  %vm62_vm2 = vcmask 1043456  }
   0xc   :  { %v44_v1 = vperm.slane %v42_v0, 0  ;;  %v45_v2 = vperm.slane %v42_v0, 1  ;;  %v46_v3 = vperm.slane %v42_v0, 2  ;;  %v47_v4 = vperm.slane %v42_v0, 3  ;;  %v40_v12 = vld [vmem:[#allocation2] sm:$0xff]  ;;  %v41_v18 = vld [vmem:[#allocation2 + $0x8] sm:$0xff] }
   0xd   :  { %v48_v5 = vperm.slane %v42_v0, 4  ;;  %v49_v6 = vperm.slane %v42_v0, 5  ;;  %v50_v7 = vperm.slane %v42_v0, 6  ;;  %v51_v8 = vperm.slane %v42_v0, 7  ;;  %s174_s0 = smov [#allocation7]   ;;  %s80_s21 = sshll.u32 %s205_s2, 4  ;;  %s81_s21 = int_to_ptr.hbm [resolvable:$true] %s80_s21 }
   0xe   :  { %v52_v9 = vrot.slane %v45_v2, 6  ;;  %v53_v10 = vrot.slane %v46_v3, 4  ;;  %v54_v11 = vrot.slane %v47_v4, 2  ;;  %s78_s1 = sshll.u32 %s174_s0, 4  ;;  %s79_s1 = int_to_ptr.vmem [resolvable:$true] %s78_s1 }
   0xf   :  { %v55_v13 = vrot.slane %v49_v6, 6  ;;  %v56_v14 = vrot.slane %v50_v7, 4  ;;  %v57_v15 = vrot.slane %v51_v8, 2 }
  0x10   :  { %v59_v16 = vsel %vm58_vm0, %v44_v1, %v52_v9  ;;  %v61_v17 = vsel %vm60_vm1, %v53_v10, %v54_v11 }
  0x11   :  { %v63_v19 = vsel %vm62_vm2, %v59_v16, %v61_v17  ;;  %v64_v20 = vsel %vm58_vm0, %v48_v5, %v55_v13  ;;  %v65_v21 = vsel %vm60_vm1, %v56_v14, %v57_v15 }
  0x12   :  { %v69_v22 = vadd.f32 %v63_v19, %v40_v12  ;;  %v66_v23 = vsel %vm62_vm2, %v64_v20, %v65_v21 }
  0x13   :  { %v70_v24 = vadd.f32 %v66_v23, %v41_v18 }
  0x14   :  { %71 = vst [vmem:[#allocation7] sm:$0xff] %v69_v22 }
  0x15   :  { %72 = vst [vmem:[#allocation7 + $0x8] sm:$0xff] %v70_v24 }
  0x16   :  { %83 = dma.vmem_to_hbm [thread:$0]  %s79_s1, 256, %s81_s21, [#allocation4]  }
  0x17   :  { %170 = dma.done.wait [#allocation4], 256  }
  0x18   :  { %171 = vsyncadd [#allocation4], 4294967040 }
  0x19   :  { %88 = vsyncpa [#allocation3], 1 }
  0x1a   :  { %89 = vsyncpa [#allocation6], 1 }
  0x1b   :  { %90 = vsyncpa [#allocation4], 1 }

</bundles_post_ra>
